<compile_context>
chip_gen: v7x
topology: tpu7x:2x2x1
jax: 0.10.0
libtpu: 0.0.40
codegen_flags: <defaults>
</compile_context>

<pallas_src>
import jax
import jax.numpy as jnp
from jax.experimental import pallas as pl
from jax.experimental.pallas import tpu as pltpu


# ----------------------------------------------------------------------------
# Pallas kernel: scatter the learnable ctx rows into the frozen prompt template
# (which is aliased to the output and stays resident in HBM).
# ----------------------------------------------------------------------------
def _make_ctx_scatter_kernel(Bp, Bn, n_ctx_pos, n_ctx_neg):
    def kernel(ctx_pos_ref, ctx_neg_ref, tmpl_ref, out_ref, sem):
        # out_ref aliases tmpl_ref (input_output_aliases={2: 0}); the frozen
        # prefix/suffix rows are already in place, so only the ctx rows are
        # written — two DMAs, then wait.
        del tmpl_ref  # unused: its contents arrive through the alias
        cp = pltpu.make_async_copy(
            ctx_pos_ref, out_ref.at[0:Bp, 1:1 + n_ctx_pos, :], sem.at[0])
        cn = pltpu.make_async_copy(
            ctx_neg_ref, out_ref.at[Bp:Bp + Bn, 1:1 + n_ctx_neg, :], sem.at[1])
        cp.start()
        cn.start()
        cp.wait()
        cn.wait()

    return kernel


def make_prompt_scatter_fn(Bp, Bn, n_ctx_pos, n_ctx_neg, L, D, dtype):
    """Builds a pallas_call:  (ctx_pos, ctx_neg, template) -> prompts (B, L, D)."""
    assert 1 + n_ctx_pos <= L and 1 + n_ctx_neg <= L
    B = Bp + Bn
    itemsize = jnp.dtype(dtype).itemsize
    ctx_bytes = (Bp * n_ctx_pos + Bn * n_ctx_neg) * D * itemsize
    # Pure scatter: read ctx rows + write ctx rows (frozen rows never move).
    cost = pl.CostEstimate(flops=0, transcendentals=0, bytes_accessed=2 * ctx_bytes)

    vmem = pl.BlockSpec(memory_space=pltpu.MemorySpace.VMEM)  # tiny ctx pieces
    hbm = pl.BlockSpec(memory_space=pl.ANY)                   # template / output

    return pl.pallas_call(
        _make_ctx_scatter_kernel(Bp, Bn, n_ctx_pos, n_ctx_neg),
        out_shape=jax.ShapeDtypeStruct((B, L, D), dtype),
        in_specs=[vmem, vmem, hbm],
        out_specs=hbm,
        scratch_shapes=[pltpu.SemaphoreType.DMA((2,))],
        input_output_aliases={2: 0},   # template -> prompts output
        cost_estimate=cost,
    )


# ----------------------------------------------------------------------------
# Prompt-learner "module": deterministic synthetic parameters + forward()
# ----------------------------------------------------------------------------
class AnomalyCLIPPromptLearnerJAX:
    def __init__(self, key, *, ctx_dim=128, context_length=16, design_details=None):
        if design_details is None:
            design_details = {
                "Prompt_length": 4,
                "learnable_text_embedding_length": 4,
                "learnable_text_embedding_depth": 3,
            }
        self.n_cls = 1                       # ['object']
        self.normal_num = 1                  # ['{}']
        self.anormaly_num = 1                # ['damaged {}']
        self.n_ctx = design_details["Prompt_length"]
        self.n_ctx_pos = self.n_ctx
        self.n_ctx_neg = self.n_ctx
        self.text_encoder_n_ctx = design_details["learnable_text_embedding_length"]
        self.compound_prompts_depth = design_details["learnable_text_embedding_depth"]
        self.ctx_dim = ctx_dim
        self.L = context_length

        ks = jax.random.split(key, 8)
        std = 0.02
        f32 = jnp.float32
        D = ctx_dim

        # learnable contexts: (n_cls, num_states, n_ctx, ctx_dim)
        self.ctx_pos = std * jax.random.normal(
            ks[0], (self.n_cls, self.normal_num, self.n_ctx_pos, D), f32)
        self.ctx_neg = std * jax.random.normal(
            ks[1], (self.n_cls, self.anormaly_num, self.n_ctx_neg, D), f32)

        # frozen token-embedding pieces (synthetic stand-in for CLIP token_embedding)
        S_pos = self.L - 1 - self.n_ctx_pos
        S_neg = self.L - 1 - self.n_ctx_neg
        assert S_pos > 0 and S_neg > 0
        self.token_prefix_pos = std * jax.random.normal(
            ks[2], (self.n_cls, self.normal_num, 1, D), f32)
        self.token_suffix_pos = std * jax.random.normal(
            ks[3], (self.n_cls, self.normal_num, S_pos, D), f32)
        self.token_prefix_neg = std * jax.random.normal(
            ks[4], (self.n_cls, self.anormaly_num, 1, D), f32)
        self.token_suffix_neg = std * jax.random.normal(
            ks[5], (self.n_cls, self.anormaly_num, S_neg, D), f32)

        # synthetic tokenized prompts (int32), shape (n_cls, num_states, L)
        self.tokenized_prompts_pos = (
            jnp.arange(self.n_cls * self.normal_num * self.L, dtype=jnp.int32)
            .reshape(self.n_cls, self.normal_num, self.L) % 1000)
        self.tokenized_prompts_neg = (
            (jnp.arange(self.n_cls * self.anormaly_num * self.L, dtype=jnp.int32) + 7)
            .reshape(self.n_cls, self.anormaly_num, self.L) % 1000)
        # Frozen buffers -> the batch-axis concat is hoisted out of forward().
        self.tokenized_prompts = jnp.concatenate(
            [self.tokenized_prompts_pos.reshape(-1, self.L),
             self.tokenized_prompts_neg.reshape(-1, self.L)], axis=0)

        # compound prompts text: list of (text_encoder_n_ctx, ctx_dim)
        self.compound_prompts_text = [
            std * jax.random.normal(ks[6 + i % 2],
                                    (self.text_encoder_n_ctx, D), f32)
            for i in range(self.compound_prompts_depth - 1)
        ]
        # TODO(synk): compound_prompt_projections (Linear ctx_dim->896) exist in
        # __init__ but are never used in forward(), so they are not materialized.

        # ---- one-time frozen [prefix | zeros | suffix] template (B, L, D) ----
        Bp = self.n_cls * self.normal_num
        Bn = self.n_cls * self.anormaly_num
        self._Bp, self._Bn = Bp, Bn
        prefix_pos = self.token_prefix_pos.reshape(Bp, 1, D)
        suffix_pos = self.token_suffix_pos.reshape(Bp, S_pos, D)
        prefix_neg = self.token_prefix_neg.reshape(Bn, 1, D)
        suffix_neg = self.token_suffix_neg.reshape(Bn, S_neg, D)
        tmpl_pos = jnp.concatenate(
            [prefix_pos, jnp.zeros((Bp, self.n_ctx_pos, D), f32), suffix_pos], axis=1)
        tmpl_neg = jnp.concatenate(
            [prefix_neg, jnp.zeros((Bn, self.n_ctx_neg, D), f32), suffix_neg], axis=1)
        self._prompt_template = jnp.concatenate([tmpl_pos, tmpl_neg], axis=0)

        # ---- build the Pallas ctx-scatter callable once (static shapes) ----
        self._scatter = make_prompt_scatter_fn(
            Bp, Bn, self.n_ctx_pos, self.n_ctx_neg, self.L, D, f32)

    def forward(self, cls_id=None):
        D = self.ctx_dim
        ctx_pos = self.ctx_pos.reshape(-1, self.n_ctx_pos, D)   # metadata-only reshape
        ctx_neg = self.ctx_neg.reshape(-1, self.n_ctx_neg, D)

        # Pallas hot path: scatter the learnable ctx rows into the frozen template.
        prompts = self._scatter(ctx_pos, ctx_neg, self._prompt_template)

        # The output is a valid template for the next call (frozen rows unchanged,
        # ctx rows fully overwritten every call).  Rebinding keeps the module
        # correct even when a jitted caller donates the template buffer so the
        # alias becomes a true in-place HBM update.
        self._prompt_template = prompts

        return prompts, self.tokenized_prompts, self.compound_prompts_text


# ----------------------------------------------------------------------------
# Reference (pure jnp) for correctness check
# ----------------------------------------------------------------------------
def reference_forward(m: AnomalyCLIPPromptLearnerJAX):
    prompts_pos = jnp.concatenate(
        [m.token_prefix_pos, m.ctx_pos, m.token_suffix_pos], axis=2)
    prompts_neg = jnp.concatenate(
        [m.token_prefix_neg, m.ctx_neg, m.token_suffix_neg], axis=2)
    L, D = prompts_pos.shape[2], prompts_pos.shape[3]
    prompts = jnp.concatenate(
        [prompts_pos.reshape(-1, L, D), prompts_neg.reshape(-1, L, D)], axis=0)
    tok = jnp.concatenate(
        [m.tokenized_prompts_pos.reshape(-1, m.L),
         m.tokenized_prompts_neg.reshape(-1, m.L)], axis=0)
    return prompts, tok


if __name__ == "__main__":
    key = jax.random.PRNGKey(0)
    # Small shapes consistent with the module:
    #   context_length L=16 (stand-in for 77),
    #   ctx_dim D=128 (lane-dense stand-in for CLIP's 768 = 6*128),
    #   Prompt_length n_ctx=4, n_cls=1, one normal + one anomaly state.
    module = AnomalyCLIPPromptLearnerJAX(key, ctx_dim=128, context_length=16)

    # --- first forward ---
    prompts, tokenized_prompts, compound = module.forward()
    jax.block_until_ready(prompts)
    jax.block_until_ready(tokenized_prompts)

    ref_prompts, ref_tok = reference_forward(module)
    assert prompts.shape == (2, 16, 128), prompts.shape
    assert tokenized_prompts.shape == (2, 16), tokenized_prompts.shape
    assert len(compound) == module.compound_prompts_depth - 1
    assert jnp.allclose(prompts, ref_prompts, atol=1e-6)
    assert jnp.array_equal(tokenized_prompts, ref_tok)

    # --- second forward with updated learnable ctx (simulated training step):
    #     exercises template reuse + ctx-row overwrite semantics ---
    module.ctx_pos = module.ctx_pos * 1.5 + 0.01
    module.ctx_neg = module.ctx_neg * 0.5 - 0.02
    prompts2, tok2, _ = module.forward()
    jax.block_until_ready(prompts2)
    ref_prompts2, ref_tok2 = reference_forward(module)
    assert jnp.allclose(prompts2, ref_prompts2, atol=1e-6)
    assert jnp.array_equal(tok2, ref_tok2)

    print("KERNEL_OK")
</pallas_src>

<mosaic_0001>
module attributes {stable_mosaic.version = 11 : i64} {
  func.func @kernel(%arg0: memref<1x4x128xf32, #tpu.memory_space<vmem>>, %arg1: memref<1x4x128xf32, #tpu.memory_space<vmem>>, %arg2: memref<2x16x128xf32, #tpu.memory_space<any>>, %arg3: memref<2x16x128xf32, #tpu.memory_space<any>>, %arg4: memref<2x!tpu.dma_semaphore, #tpu.memory_space<semaphore_mem>>) attributes {dimension_semantics = [], scalar_prefetch = 0 : i64, scratch_operands = 1 : i64, tpu.core_type = #tpu.core_type<tc>} {
    %c0_i32 = arith.constant 0 : i32
    %c0_i32_0 = arith.constant 0 : i32
    %c1_i32 = arith.constant 1 : i32
    %c0_i32_1 = arith.constant 0 : i32
    %0 = tpu.memref_slice %arg3[%c0_i32_0, %c1_i32, %c0_i32_1] : memref<2x16x128xf32, #tpu.memory_space<any>> -> memref<1x4x128xf32, #tpu.memory_space<any>>
    %1 = tpu.memref_slice %arg4[%c0_i32] : memref<2x!tpu.dma_semaphore, #tpu.memory_space<semaphore_mem>> -> memref<1x!tpu.dma_semaphore, #tpu.memory_space<semaphore_mem>>
    %2 = tpu.memref_squeeze %1 : memref<1x!tpu.dma_semaphore, #tpu.memory_space<semaphore_mem>> -> memref<!tpu.dma_semaphore, #tpu.memory_space<semaphore_mem>>
    tpu.enqueue_dma source(%arg0 : memref<1x4x128xf32, #tpu.memory_space<vmem>>) target(%0 : memref<1x4x128xf32, #tpu.memory_space<any>>) target_semaphore(%2 : memref<!tpu.dma_semaphore, #tpu.memory_space<semaphore_mem>>)
    %c1_i32_2 = arith.constant 1 : i32
    %c1_i32_3 = arith.constant 1 : i32
    %c1_i32_4 = arith.constant 1 : i32
    %c0_i32_5 = arith.constant 0 : i32
    %3 = tpu.memref_slice %arg3[%c1_i32_3, %c1_i32_4, %c0_i32_5] : memref<2x16x128xf32, #tpu.memory_space<any>> -> memref<1x4x128xf32, #tpu.memory_space<any>>
    %4 = tpu.memref_slice %arg4[%c1_i32_2] : memref<2x!tpu.dma_semaphore, #tpu.memory_space<semaphore_mem>> -> memref<1x!tpu.dma_semaphore, #tpu.memory_space<semaphore_mem>>
    %5 = tpu.memref_squeeze %4 : memref<1x!tpu.dma_semaphore, #tpu.memory_space<semaphore_mem>> -> memref<!tpu.dma_semaphore, #tpu.memory_space<semaphore_mem>>
    tpu.enqueue_dma source(%arg1 : memref<1x4x128xf32, #tpu.memory_space<vmem>>) target(%3 : memref<1x4x128xf32, #tpu.memory_space<any>>) target_semaphore(%5 : memref<!tpu.dma_semaphore, #tpu.memory_space<semaphore_mem>>)
    %c0_i32_6 = arith.constant 0 : i32
    %c0_i32_7 = arith.constant 0 : i32
    %c1_i32_8 = arith.constant 1 : i32
    %c0_i32_9 = arith.constant 0 : i32
    %6 = tpu.memref_slice %arg3[%c0_i32_7, %c1_i32_8, %c0_i32_9] : memref<2x16x128xf32, #tpu.memory_space<any>> -> memref<1x4x128xf32, #tpu.memory_space<any>>
    %7 = tpu.memref_slice %arg4[%c0_i32_6] : memref<2x!tpu.dma_semaphore, #tpu.memory_space<semaphore_mem>> -> memref<1x!tpu.dma_semaphore, #tpu.memory_space<semaphore_mem>>
    %8 = tpu.memref_squeeze %7 : memref<1x!tpu.dma_semaphore, #tpu.memory_space<semaphore_mem>> -> memref<!tpu.dma_semaphore, #tpu.memory_space<semaphore_mem>>
    tpu.wait_dma2 semaphore(%8 : memref<!tpu.dma_semaphore, #tpu.memory_space<semaphore_mem>>) src(%arg0 : memref<1x4x128xf32, #tpu.memory_space<vmem>>) dst(%6 : memref<1x4x128xf32, #tpu.memory_space<any>>)
    %c1_i32_10 = arith.constant 1 : i32
    %c1_i32_11 = arith.constant 1 : i32
    %c1_i32_12 = arith.constant 1 : i32
    %c0_i32_13 = arith.constant 0 : i32
    %9 = tpu.memref_slice %arg3[%c1_i32_11, %c1_i32_12, %c0_i32_13] : memref<2x16x128xf32, #tpu.memory_space<any>> -> memref<1x4x128xf32, #tpu.memory_space<any>>
    %10 = tpu.memref_slice %arg4[%c1_i32_10] : memref<2x!tpu.dma_semaphore, #tpu.memory_space<semaphore_mem>> -> memref<1x!tpu.dma_semaphore, #tpu.memory_space<semaphore_mem>>
    %11 = tpu.memref_squeeze %10 : memref<1x!tpu.dma_semaphore, #tpu.memory_space<semaphore_mem>> -> memref<!tpu.dma_semaphore, #tpu.memory_space<semaphore_mem>>
    tpu.wait_dma2 semaphore(%11 : memref<!tpu.dma_semaphore, #tpu.memory_space<semaphore_mem>>) src(%arg1 : memref<1x4x128xf32, #tpu.memory_space<vmem>>) dst(%9 : memref<1x4x128xf32, #tpu.memory_space<any>>)
    return
  }
}

</mosaic_0001>

<bundles_post_ra>
// kernel: tpu_custom_call.1
= control target key start
LH: loop header
LB: loop body
LE: loop exit
PB: predicated region body
PF: predicated region fallthrough
CT: control target
= control target key end

     0   :  { %s165_s0 = inlined_call_operand.vmem [shape: f32[1,4,128], index: 0, kind: input, shape index: {}]   ;;  %s166_s2 = inlined_call_operand.hbm [shape: f32[2,16,128], index: 2, kind: input, shape index: {}, may-alias: {2,3}]   ;;  %s167_s3 = inlined_call_operand.hbm [shape: f32[2,16,128], index: 3, kind: output, shape index: {}, may-alias: {2,3}]   ;;  %s168_s1 = inlined_call_operand.vmem [shape: f32[1,4,128], index: 1, kind: input, shape index: {}]  }
   0x1   :  { %s12_s14 = scalar_lea.hbm %s167_s3, 16  ;;  %s20_s17 = sshll.u32 %s165_s0, 4  ;;  %s21_s17 = int_to_ptr.vmem [resolvable:$true] %s20_s17 }
   0x2   :  { %s141_s20 = scalar_lea.hbm %s167_s3, 272  ;;  %s58_s2 = scalar_lea.vmem %s21_s17, 64 }
   0x3   :  { %p59_p0 = scmp.ne.s32.totalorder %s21_s17, %s58_s2  ;;  %p63_p1 = scmp.lt.s32.totalorder %s21_s17, %s21_s17 }
   0x4   :  { %p64_p2 = scmp.lt.s32.totalorder %s58_s2, %s58_s2 }
   0x6   :  { %p65_p3 = por %p64_p2, %p63_p1 }
   0x8   :  { %p66_p4 = pnand %p65_p3, %p59_p0 }
   0xa   :  { %69 = shalt.err (!%p66_p4)  }
   0xb   :  { %s82_s23 = scalar_lea.hbm %s167_s3, 80  ;;  %s72_s25 = scalar_lea.hbm %s167_s3, 512 }
   0xc   :  { %p71_p5 = scmp.ne.s32.totalorder %s12_s14, %s82_s23  ;;  %p73_p6 = scmp.lt.u32.totalorder %s12_s14, %s167_s3 }
   0xd   :  { %p74_p7 = scmp.lt.u32.totalorder %s72_s25, %s82_s23  ;;  %p76_p9 = scmp.lt.u32.totalorder %s82_s23, %s12_s14 }
   0xf   :  { %p75_p8 = por %p74_p7, %p73_p6 }
  0x11   :  { %p77_p10 = por %p76_p9, %p75_p8 }
  0x13   :  { %p78_p11 = pnand %p77_p10, %p71_p5 }
  0x15   :  { %81 = shalt.err (!%p78_p11)  }
  0x16   :  { %23 = dma.vmem_to_hbm [thread:$0]  %s21_s17, 64, %s12_s14, [#allocation2] }
  0x17   :  { %s33_s30 = sshll.u32 %s168_s1, 4  ;;  %s34_s30 = int_to_ptr.vmem [resolvable:$true] %s33_s30 }
  0x18   :  { %s83_s4 = scalar_lea.vmem %s34_s30, 64  ;;  %p88_p13 = scmp.lt.s32.totalorder %s34_s30, %s34_s30 }
  0x19   :  { %p84_p12 = scmp.ne.s32.totalorder %s34_s30, %s83_s4  ;;  %p89_p0 = scmp.lt.s32.totalorder %s83_s4, %s83_s4 }
  0x1b   :  { %p90_p1 = por %p89_p0, %p88_p13 }
  0x1d   :  { %p91_p2 = pnand %p90_p1, %p84_p12 }
  0x1f   :  { %94 = shalt.err (!%p91_p2)  }
  0x20   :  { %s107_s7 = scalar_lea.hbm %s167_s3, 336  ;;  %p98_p4 = scmp.lt.u32.totalorder %s141_s20, %s167_s3 }
  0x21   :  { %p96_p3 = scmp.ne.s32.totalorder %s141_s20, %s107_s7  ;;  %p99_p5 = scmp.lt.u32.totalorder %s72_s25, %s107_s7 }
  0x22   :  { %p101_p7 = scmp.lt.u32.totalorder %s107_s7, %s141_s20 }
  0x23   :  { %p100_p6 = por %p99_p5, %p98_p4 }
  0x25   :  { %p102_p8 = por %p101_p7, %p100_p6 }
  0x27   :  { %p103_p9 = pnand %p102_p8, %p96_p3 }
  0x29   :  { %106 = shalt.err (!%p103_p9)  }
  0x2a   :  { %36 = dma.vmem_to_hbm [thread:$0]  %s34_s30, 64, %s141_s20, [#allocation2 + $0x1] }
  0x2b   :  { %108 = dma.done.wait [#allocation2], 64 }
  0x2c   :  { %109 = vsyncadd [#allocation2], 4294967232 }
  0x2d   :  { %110 = dma.done.wait [#allocation2 + $0x1], 64 }
  0x2e   :  { %111 = vsyncadd [#allocation2 + $0x1], 4294967232 }
  0x2f   :  { %43 = vsyncmov [#allocation2] }
  0x32   :  { %s44_s1 = vpop.sfrf %43 }
  0x33   :  { %p56_p10 = scmp.ne.s32.totalorder %s44_s1, 0 }
  0x35   :  { %48 = shalt.err (%p56_p10)  }
  0x36   :  { %50 = vsyncmov [#allocation2 + $0x1] }
  0x39   :  { %s51_s10 = vpop.sfrf %50 }
  0x3a   :  { %p57_p11 = scmp.ne.s32.totalorder %s51_s10, 0 }
  0x3c   :  { %55 = shalt.err (%p57_p11)  }

</bundles_post_ra>
